<compile_context>
chip_gen: v5e
topology: v5e:2x2
jax: 0.10.0
libtpu: 0.0.40
codegen_flags: <defaults>
</compile_context>

<pallas_src>
import math
from functools import partial

import jax
import jax.numpy as jnp
from jax.experimental import pallas as pl
from jax.experimental.pallas import tpu as pltpu


def _qkv_attention_kernel(q_ref, k_ref, v_ref, o_ref, *, scale, t_valid):
    # q_ref: (Hb, ch, TQ)   k_ref, v_ref: (Hb, ch, T)   o_ref: (Hb, ch, TQ)
    q = q_ref[...]
    q = q * jnp.asarray(scale, dtype=q.dtype)   # folded ch**-0.5, q tile only
    k = k_ref[...]
    v = v_ref[...]

    # scores[h, t, s] = sum_c q[h, c, t] * k[h, c, s]  (native-dtype MXU, f32 acc)
    s = jnp.einsum("hct,hcs->hts", q, k, preferred_element_type=jnp.float32)

    if t_valid < s.shape[-1]:
        # Key positions beyond the true sequence length were zero-padded in the
        # wrapper; mask them out of the softmax.
        key_pos = jax.lax.broadcasted_iota(jnp.int32, s.shape, dimension=2)
        s = jnp.where(key_pos < t_valid, s, jnp.float32(-1e30))

    # Numerically stable softmax numerator in f32; normalization deferred until
    # after the PV matmul (no (TQ, T) divide).
    m = jnp.max(s, axis=-1, keepdims=True)
    p = jnp.exp(s - m)
    pv = p.astype(v.dtype)                       # bf16 probabilities for the MXU

    # out[h, c, t] = sum_s v[h, c, s] * p[h, t, s]
    acc = jnp.einsum("hcs,hts->hct", v, pv, preferred_element_type=jnp.float32)
    # Row sums in lane orientation (Hb, 1, TQ) via a tiny ones-vector matmul.
    ones = jnp.ones((pv.shape[0], 1, pv.shape[2]), dtype=pv.dtype)
    l = jnp.einsum("hos,hts->hot", ones, pv, preferred_element_type=jnp.float32)

    o_ref[...] = (acc * pl.reciprocal(l, approx=True)).astype(o_ref.dtype)


def _vmem_budget_bytes():
    # Physical VMEM per TensorCore: 128 MiB (v5e/v6e), 64 MiB (v7x). Leave
    # headroom for compiler scratch; cap at 96 MiB per the v6e guidance.
    phys = 64 * 1024 * 1024   # conservative fallback (v7x)
    try:
        phys = int(pltpu.get_tpu_info().vmem_capacity_bytes)
    except Exception:
        pass
    return min(phys * 3 // 4, 96 * 1024 * 1024)


def _working_set_bytes(hb, tq, t_pad, ch, itemsize):
    # Double-buffered q/k/v/out blocks + f32 score/probability intermediates.
    io = 2 * hb * ch * itemsize * (2 * tq + 2 * t_pad)
    interm = 3 * hb * tq * t_pad * 4 + hb * ch * tq * 4
    return io + interm


def _pick_tiles(b, ch, t_pad, itemsize, budget):
    # Query tile: biggest lane-dense tile whose working set fits the budget.
    tq = 128
    for cand in (512, 256, 128):
        if t_pad % cand == 0 and _working_set_bytes(1, cand, t_pad, ch, itemsize) <= budget:
            tq = cand
            break
    # Head block: in the small-T / many-head regime batch heads per grid step.
    hb = 1
    if t_pad <= 512:
        for cand in (8, 4, 2):
            if b % cand == 0 and _working_set_bytes(cand, tq, t_pad, ch, itemsize) <= budget:
                hb = cand
                break
    return hb, tq


def qkv_attention_legacy(qkv, n_heads):
    """qkv: (bs, 3 * n_heads * ch, T) -> (bs, n_heads * ch, T)."""
    bs, width, t = qkv.shape
    assert width % (3 * n_heads) == 0
    ch = width // (3 * n_heads)
    b = bs * n_heads
    scale = float(ch) ** -0.5            # both ch**-0.25 factors folded into q

    # Free reshape (no data movement): channel axis factors as (head, qkv, ch).
    x = qkv.reshape(b, 3, ch, t)

    # Pad the sequence axis to a lane-friendly multiple of 128 (masked in-kernel).
    t_pad = -(-t // 128) * 128
    if t_pad != t:
        x = jnp.pad(x, ((0, 0), (0, 0), (0, 0), (0, t_pad - t)))

    itemsize = jnp.dtype(qkv.dtype).itemsize
    budget = _vmem_budget_bytes()
    hb, tq = _pick_tiles(b, ch, t_pad, itemsize, budget)

    grid = (b // hb, t_pad // tq)
    # Megacore shard on heads; mark the query-tile axis "arbitrary" when there
    # are >= 2 head blocks so both cores keep K/V slab reuse across query tiles.
    dim_sem = ("parallel", "arbitrary" if grid[0] >= 2 else "parallel")

    out = pl.pallas_call(
        partial(_qkv_attention_kernel, scale=scale, t_valid=t),
        out_shape=jax.ShapeDtypeStruct((b, ch, t_pad), qkv.dtype),
        grid_spec=pltpu.PrefetchScalarGridSpec(
            num_scalar_prefetch=0,
            grid=grid,
            in_specs=[
                # q: one query tile for a block of heads
                pl.BlockSpec((hb, None, ch, tq), lambda i, qi: (i, 0, 0, qi)),
                # k, v: full-length slabs, resident across the inner query-tile axis
                pl.BlockSpec((hb, None, ch, t_pad), lambda i, qi: (i, 1, 0, 0)),
                pl.BlockSpec((hb, None, ch, t_pad), lambda i, qi: (i, 2, 0, 0)),
            ],
            out_specs=pl.BlockSpec((hb, ch, tq), lambda i, qi: (i, 0, qi)),
        ),
        compiler_params=pltpu.CompilerParams(
            dimension_semantics=dim_sem,
            vmem_limit_bytes=budget,
        ),
    )(x, x, x)

    if t_pad != t:
        out = out[:, :, :t]
    return out.reshape(bs, n_heads * ch, t)


def _reference(qkv, n_heads):
    # Mirrors the PyTorch forward exactly.
    bs, width, t = qkv.shape
    ch = width // (3 * n_heads)
    x = qkv.reshape(bs * n_heads, 3 * ch, t)
    q, k, v = x[:, :ch], x[:, ch:2 * ch], x[:, 2 * ch:]
    scale = 1.0 / math.sqrt(math.sqrt(ch))
    w = jnp.einsum("bct,bcs->bts", q * scale, k * scale)
    w = jax.nn.softmax(w.astype(jnp.float32), axis=-1).astype(w.dtype)
    a = jnp.einsum("bts,bcs->bct", w, v)
    return a.reshape(bs, -1, t)


if __name__ == "__main__":
    root = jax.random.PRNGKey(0)
    cases = [
        # (bs, n_heads, ch, t, dtype, atol, rtol)
        (2, 2, 16, 128, jnp.float32, 5e-3, 5e-3),    # head-blocking path (Hb > 1)
        (1, 3, 8, 96, jnp.float32, 5e-3, 5e-3),      # T % 128 != 0: padded + masked
        (2, 4, 32, 256, jnp.bfloat16, 3e-2, 3e-2),   # native bf16 MXU path
    ]
    keys = jax.random.split(root, len(cases))
    for key, (bs, n_heads, ch, t, dtype, atol, rtol) in zip(keys, cases):
        width = 3 * n_heads * ch
        qkv = jax.random.normal(key, (bs, width, t), dtype=jnp.float32).astype(dtype)

        out = jax.block_until_ready(qkv_attention_legacy(qkv, n_heads))
        ref = _reference(qkv, n_heads)

        assert out.shape == (bs, n_heads * ch, t)
        # Tolerances account for the approximate EUP reciprocal (and bf16 MXU
        # accumulation-order differences in the bf16 case).
        ok = jnp.allclose(out.astype(jnp.float32), ref.astype(jnp.float32),
                          atol=atol, rtol=rtol)
        assert ok, f"mismatch vs reference for case {(bs, n_heads, ch, t, dtype)}"

    print("KERNEL_OK")
</pallas_src>

<mosaic_0001>
module attributes {stable_mosaic.version = 11 : i64} {
  func.func @_qkv_attention_kernel(%arg0: i32, %arg1: i32, %arg2: memref<4x1x16x128xf32, #tpu.memory_space<vmem>>, %arg3: memref<4x1x16x128xf32, #tpu.memory_space<vmem>>, %arg4: memref<4x1x16x128xf32, #tpu.memory_space<vmem>>, %arg5: memref<4x16x128xf32, #tpu.memory_space<vmem>>) attributes {dimension_semantics = [#tpu.dimension_semantics<parallel>, #tpu.dimension_semantics<parallel>], iteration_bounds = array<i64: 1, 1>, scalar_prefetch = 0 : i64, scratch_operands = 0 : i64, tpu.core_type = #tpu.core_type<tc>, window_params = [{transform_indices = @transform_0, window_bounds = array<i64: 4, 1, 16, 128>}, {transform_indices = @transform_1, window_bounds = array<i64: 4, 1, 16, 128>}, {transform_indices = @transform_2, window_bounds = array<i64: 4, 1, 16, 128>}, {transform_indices = @transform_3, window_bounds = array<i64: 4, 16, 128>}]} {
    %c0 = arith.constant 0 : index
    %c0_0 = arith.constant 0 : index
    %c0_1 = arith.constant 0 : index
    %c0_2 = arith.constant 0 : index
    %0 = vector.load %arg2[%c0, %c0_0, %c0_1, %c0_2] : memref<4x1x16x128xf32, #tpu.memory_space<vmem>>, vector<4x1x16x128xf32>
    %1 = vector.shape_cast %0 : vector<4x1x16x128xf32> to vector<4x16x128xf32>
    %cst = arith.constant 2.500000e-01 : f32
    %2 = vector.broadcast %cst : f32 to vector<4x16x128xf32>
    %3 = arith.mulf %1, %2 : vector<4x16x128xf32>
    %c0_3 = arith.constant 0 : index
    %c0_4 = arith.constant 0 : index
    %c0_5 = arith.constant 0 : index
    %c0_6 = arith.constant 0 : index
    %4 = vector.load %arg3[%c0_3, %c0_4, %c0_5, %c0_6] : memref<4x1x16x128xf32, #tpu.memory_space<vmem>>, vector<4x1x16x128xf32>
    %5 = vector.shape_cast %4 : vector<4x1x16x128xf32> to vector<4x16x128xf32>
    %c0_7 = arith.constant 0 : index
    %c0_8 = arith.constant 0 : index
    %c0_9 = arith.constant 0 : index
    %c0_10 = arith.constant 0 : index
    %6 = vector.load %arg4[%c0_7, %c0_8, %c0_9, %c0_10] : memref<4x1x16x128xf32, #tpu.memory_space<vmem>>, vector<4x1x16x128xf32>
    %7 = vector.shape_cast %6 : vector<4x1x16x128xf32> to vector<4x16x128xf32>
    "tpu.trace_start"() <{level = 10 : i32, message = "hct,hcs->hts"}> : () -> ()
    %cst_11 = arith.constant dense<0.000000e+00> : vector<4x128x128xf32>
    %8 = tpu.matmul %3, %5, %cst_11 {dimension_numbers = #tpu.dot_dimension_numbers<[1], [1], [2], [2], [0, 0, 0, 2, 1, 2], [0], [0]>} : vector<4x16x128xf32>, vector<4x16x128xf32>, vector<4x128x128xf32> -> vector<4x128x128xf32>
    "tpu.trace_stop"() : () -> ()
    %cst_12 = arith.constant dense<0xFF800000> : vector<4x128xf32>
    %9 = vector.multi_reduction <maximumf>, %8, %cst_12 [2] : vector<4x128x128xf32> to vector<4x128xf32>
    %10 = vector.shape_cast %9 : vector<4x128xf32> to vector<4x128x1xf32>
    %11 = vector.broadcast %10 : vector<4x128x1xf32> to vector<4x128x128xf32>
    %12 = arith.subf %8, %11 : vector<4x128x128xf32>
    %13 = math.exp %12 : vector<4x128x128xf32>
    "tpu.trace_start"() <{level = 10 : i32, message = "hcs,hts->hct"}> : () -> ()
    %cst_13 = arith.constant dense<0.000000e+00> : vector<4x16x128xf32>
    %14 = tpu.matmul %7, %13, %cst_13 {dimension_numbers = #tpu.dot_dimension_numbers<[2], [2], [1], [1], [0, 0, 0, 1, 1, 1], [0], [0]>} : vector<4x16x128xf32>, vector<4x128x128xf32>, vector<4x16x128xf32> -> vector<4x16x128xf32>
    %cst_14 = arith.constant 1.000000e+00 : f32
    "tpu.trace_stop"() : () -> ()
    %15 = vector.broadcast %cst_14 : f32 to vector<4x1x128xf32>
    "tpu.trace_start"() <{level = 10 : i32, message = "hos,hts->hot"}> : () -> ()
    %cst_15 = arith.constant dense<0.000000e+00> : vector<4x1x128xf32>
    %16 = tpu.matmul %15, %13, %cst_15 {dimension_numbers = #tpu.dot_dimension_numbers<[2], [2], [1], [1], [0, 0, 0, 1, 1, 1], [0], [0]>} : vector<4x1x128xf32>, vector<4x128x128xf32>, vector<4x1x128xf32> -> vector<4x1x128xf32>
    "tpu.trace_stop"() : () -> ()
    %17 = tpu.reciprocal %16 {approx = true} : vector<4x1x128xf32> -> vector<4x1x128xf32>
    %18 = vector.broadcast %17 : vector<4x1x128xf32> to vector<4x16x128xf32>
    %19 = arith.mulf %14, %18 : vector<4x16x128xf32>
    %c0_16 = arith.constant 0 : index
    %c0_17 = arith.constant 0 : index
    %c0_18 = arith.constant 0 : index
    %20 = vector.load %arg5[%c0_16, %c0_17, %c0_18] : memref<4x16x128xf32, #tpu.memory_space<vmem>>, vector<4x16x128xf32>
    tpu.vector_store %arg5[%c0_16, %c0_17, %c0_18], %19 {strides = array<i32>} : memref<4x16x128xf32, #tpu.memory_space<vmem>>, vector<4x16x128xf32>,
    return
  }
  func.func @transform_0(%arg0: i32, %arg1: i32) -> (i32, i32, i32, i32) {
    %c0_i32 = arith.constant 0 : i32
    %c0_i32_0 = arith.constant 0 : i32
    %c0_i32_1 = arith.constant 0 : i32
    return %arg0, %c0_i32, %c0_i32_0, %arg1 : i32, i32, i32, i32
  }
  func.func @transform_1(%arg0: i32, %arg1: i32) -> (i32, i32, i32, i32) {
    %c1_i32 = arith.constant 1 : i32
    %c0_i32 = arith.constant 0 : i32
    %c0_i32_0 = arith.constant 0 : i32
    %c0_i32_1 = arith.constant 0 : i32
    return %arg0, %c1_i32, %c0_i32, %c0_i32_0 : i32, i32, i32, i32
  }
  func.func @transform_2(%arg0: i32, %arg1: i32) -> (i32, i32, i32, i32) {
    %c2_i32 = arith.constant 2 : i32
    %c0_i32 = arith.constant 0 : i32
    %c0_i32_0 = arith.constant 0 : i32
    %c0_i32_1 = arith.constant 0 : i32
    return %arg0, %c2_i32, %c0_i32, %c0_i32_0 : i32, i32, i32, i32
  }
  func.func @transform_3(%arg0: i32, %arg1: i32) -> (i32, i32, i32) {
    %c0_i32 = arith.constant 0 : i32
    %c0_i32_0 = arith.constant 0 : i32
    return %arg0, %c0_i32, %arg1 : i32, i32, i32
  }
}

</mosaic_0001>

<bundles_post_ra>
// kernel: tpu_custom_call.1
= control target key start
LH: loop header
LB: loop body
LE: loop exit
PB: predicated region body
PF: predicated region fallthrough
CT: control target
= control target key end

     0   :  { %8 = vsyncpa [#allocation3], 0  ;;  %s2238_s0 = inlined_call_operand.hbm [shape: f32[4,3,16,128], index: 0, kind: input, shape index: {}]   ;;  %s2239_s1 = inlined_call_operand.hbm [shape: f32[4,3,16,128], index: 1, kind: input, shape index: {}]   ;;  %s2240_s2 = inlined_call_operand.hbm [shape: f32[4,3,16,128], index: 2, kind: input, shape index: {}]   ;;  %s2241_s3 = inlined_call_operand.hbm [shape: f32[4,16,128], index: 3, kind: output, shape index: {}]  }
   0x1   :  { %9 = vsyncpa [#allocation6], 0 }
   0x2   :  { %10 = vsyncpa [#allocation4], 0 }
   0x3   :  { %s19_s12 = sld [smem:[#allocation0]]   ;;  %s27_s15 = sshll.u32 %s2238_s0, 4  ;;  %s28_s15 = int_to_ptr.hbm [resolvable:$true] %s27_s15 }
   0x4   :  { %s1553_s16 = smov [#allocation2]   ;;  %s1554_s18 = smov 768  }
   0x5   :  { %s29_s17 = sshll.u32 %s1553_s16, 4  ;;  %36 = sst [smem:[#allocation10]] %s1554_s18  ;;  %s30_s17 = int_to_ptr.vmem [resolvable:$true] %s29_s17 }
   0x6   :  { %s1555_s19 = smov 256   ;;  %s1556_s21 = smov 2  }
   0x7   :  { %38 = sst [smem:[#allocation10 + $0x1]] %s1555_s19  ;;  %s1557_s23 = smov 128  }
   0x8   :  { %40 = sst [smem:[#allocation10 + $0x2]] %s1556_s21  ;;  %s1558_s24 = smov 8  }
   0x9   :  { %s1288_s20 = sshll.u32 %s19_s12, 26  ;;  %42 = sst [smem:[#allocation10 + $0x3]] %s1557_s23 }
   0xa   :  { %s1289_s22 = sadd.s32 134217728, %s1288_s20  ;;  %44 = sst [smem:[#allocation10 + $0x4]] %s1557_s23 }
   0xb   :  { %46 = sst [smem:[#allocation10 + $0x5]] %s1558_s24  ;;  %s1559_s25 = smov [#allocation3]  }
   0xc   :  { %s1560_s26 = smov [#allocation9]  }
   0xd   :  { %48 = dma.general %s28_s15, 1024, %s30_s17, %s1559_s25, %s1560_s26, [#allocation10], %s1289_s22, 0  }
   0xe   :  { %s53_s28 = scalar_lea.hbm %s2239_s1, 16  ;;  %s58_s29 = sld [smem:[#allocation0]]  }
   0xf   :  { %s66_s30 = sshll.u32 %s53_s28, 4  ;;  %s1561_s4 = smov [#allocation5]   ;;  %s67_s30 = int_to_ptr.hbm [resolvable:$true] %s66_s30 }
  0x10   :  { %s68_s5 = sshll.u32 %s1561_s4, 4  ;;  %s1562_s6 = smov 768   ;;  %s69_s5 = int_to_ptr.vmem [resolvable:$true] %s68_s5 }
  0x11   :  { %75 = sst [smem:[#allocation12]] %s1562_s6  ;;  %s1563_s7 = smov 256  }
  0x12   :  { %77 = sst [smem:[#allocation12 + $0x1]] %s1563_s7  ;;  %s1564_s9 = smov 2  }
  0x13   :  { %79 = sst [smem:[#allocation12 + $0x2]] %s1564_s9  ;;  %s1565_s11 = smov 128  }
  0x14   :  { %s1290_s8 = sshll.u32 %s58_s29, 26  ;;  %81 = sst [smem:[#allocation12 + $0x3]] %s1565_s11 }
  0x15   :  { %s1291_s10 = sadd.s32 134217728, %s1290_s8  ;;  %83 = sst [smem:[#allocation12 + $0x4]] %s1565_s11 }
  0x16   :  { %s1566_s12 = smov 8   ;;  %s1567_s1 = smov [#allocation6]  }
  0x17   :  { %85 = sst [smem:[#allocation12 + $0x5]] %s1566_s12  ;;  %s1568_s13 = smov [#allocation11]  }
  0x18   :  { %87 = dma.general %s67_s30, 1024, %s69_s5, %s1567_s1, %s1568_s13, [#allocation12], %s1291_s10, 0  }
  0x19   :  { %s92_s16 = scalar_lea.hbm %s2240_s2, 32  ;;  %s97_s17 = sld [smem:[#allocation0]]  }
  0x1a   :  { %s105_s18 = sshll.u32 %s92_s16, 4  ;;  %s1569_s19 = smov [#allocation7]   ;;  %s106_s18 = int_to_ptr.hbm [resolvable:$true] %s105_s18 }
  0x1b   :  { %s107_s20 = sshll.u32 %s1569_s19, 4  ;;  %s1570_s21 = smov 768   ;;  %s108_s20 = int_to_ptr.vmem [resolvable:$true] %s107_s20 }
  0x1c   :  { %114 = sst [smem:[#allocation14]] %s1570_s21  ;;  %s1571_s22 = smov 256  }
  0x1d   :  { %116 = sst [smem:[#allocation14 + $0x1]] %s1571_s22  ;;  %s1572_s24 = smov 2  }
  0x1e   :  { %118 = sst [smem:[#allocation14 + $0x2]] %s1572_s24  ;;  %s1573_s26 = smov 128  }
  0x1f   :  { %s1292_s23 = sshll.u32 %s97_s17, 26  ;;  %120 = sst [smem:[#allocation14 + $0x3]] %s1573_s26 }
  0x20   :  { %s1293_s25 = sadd.s32 134217728, %s1292_s23  ;;  %122 = sst [smem:[#allocation14 + $0x4]] %s1573_s26 }
  0x21   :  { %s1574_s0 = smov 8   ;;  %s1575_s2 = smov [#allocation6]  }
  0x22   :  { %124 = sst [smem:[#allocation14 + $0x5]] %s1574_s0  ;;  %s1576_s27 = smov [#allocation13]  }
  0x23   :  { %126 = dma.general %s106_s18, 1024, %s108_s20, %s1575_s2, %s1576_s27, [#allocation14], %s1293_s25, 0  }
  0x24   :  { %1547 = dma.done.wait [#allocation3], 1024  }
  0x25   :  { %1548 = vsyncadd [#allocation3], 4294966272 }
  0x26   :  { %1549 = dma.done.wait [#allocation6], 2048  }
  0x27   :  { %1550 = vsyncadd [#allocation6], 4294965248  ;;  %v143_v0 = vld [vmem:[#allocation2 + $0x20] sm:$0xff]  ;;  %v145_v1 = vld [vmem:[#allocation2 + $0x30] sm:$0xff]  ;;  %vm203_vm0 = vcmask 130048   ;;  %s1578_s28 = smov [#allocation8]  }
  0x28   :  { %v151_v2 = vmul.f32 0.25, %v143_v0  ;;  %v153_v3 = vmul.f32 0.25, %v145_v1  ;;  %v139_v4 = vld [vmem:[#allocation2] sm:$0xff]  ;;  %v144_v6 = vld [vmem:[#allocation2 + $0x28] sm:$0xff]  ;;  %v146_v7 = vld [vmem:[#allocation2 + $0x38] sm:$0xff]  ;;  %s1272_s29 = sshll.u32 %s1578_s28, 4  ;;  %s1273_s29 = int_to_ptr.vmem [resolvable:$true] %s1272_s29 }
  0x29   :  { %v147_v5 = vmul.f32 0.25, %v139_v4  ;;  %v140_v8 = vld [vmem:[#allocation2 + $0x8] sm:$0xff]  ;;  %v152_v9 = vmul.f32 0.25, %v144_v6  ;;  %v154_v10 = vmul.f32 0.25, %v146_v7  ;;  %v159_v13 = vld [vmem:[#allocation5 + $0x20] sm:$0xff]  ;;  %v141_v14 = vld [vmem:[#allocation2 + $0x10] sm:$0xff] }
  0x2a   :  { %462 = vxpose.xlu0.b32.start [1/2] (short) %v151_v2, 128  ;;  %607 = vxpose.xlu1.b32.start [1/2] (short) %v153_v3, 128  ;;  %v148_v11 = vmul.f32 0.25, %v140_v8  ;;  %v160_v12 = vld [vmem:[#allocation5 + $0x28] sm:$0xff]  ;;  %v149_v15 = vmul.f32 0.25, %v141_v14  ;;  %v142_v16 = vld [vmem:[#allocation2 + $0x18] sm:$0xff]  ;;  %v155_v20 = vld [vmem:[#allocation5] sm:$0xff]  ;;  %s1274_s5 = sshll.u32 %s2241_s3, 4  ;;  %s1275_s5 = int_to_ptr.hbm [resolvable:$true] %s1274_s5 }
  0x2b   :  { %171 = vxpose.xlu2.b32.start [1/2] (short) %v147_v5, 128  ;;  %556 = vmatpush.msra.mxu2 %v160_v12  ;;  %v150_v17 = vmul.f32 0.25, %v142_v16  ;;  %v156_v18 = vld [vmem:[#allocation5 + $0x8] sm:$0xff]  ;;  %v162_v19 = vld [vmem:[#allocation5 + $0x38] sm:$0xff]  ;;  %v161_v21 = vld [vmem:[#allocation5 + $0x30] sm:$0xff]  ;;  %s1579_s6 = smov 128   ;;  %s1580_s7 = smov 8  }
  0x2c   :  { %266 = vmatpush.msra.mxu0 %v156_v18  ;;  %701 = vmatpush.msra.mxu3 %v162_v19  ;;  %v158_v59 = vld [vmem:[#allocation5 + $0x18] sm:$0xff]  ;;  %v157_v60 = vld [vmem:[#allocation5 + $0x10] sm:$0xff] }
  0x2d   :  { %557 = vmatpush.msra.mxu2 %v159_v13  ;;  %411 = vmatpush.msra.mxu1 %v158_v59 }
  0x2e   :  { %267 = vmatpush.msra.mxu0 %v155_v20  ;;  %702 = vmatpush.msra.mxu3 %v161_v21 }
  0x2f   :  { %412 = vmatpush.msra.mxu1 %v157_v60 }
  0x32   :  { %463 = vxpose.xlu0.b32.end [2/2] (short) %v152_v9, 128  ;;  %608 = vxpose.xlu1.b32.end [2/2] (short) %v154_v10, 128 }
  0x33   :  { %172 = vxpose.xlu2.b32.end [2/2] (short) %v148_v11, 128 }
  0xaa   :  { %317 = vxpose.xlu0.b32.start [1/2] (short) %v149_v15, 128 }
  0xb2   :  { %318 = vxpose.xlu0.b32.end [2/2] (short) %v150_v17, 128 }
  0xc4   :  { %v187_v22 = vpop.trf.xlu2 }
  0xc5   :  { %1294 = vmatmul.msk.f32.vlgmr.msra.gmra.mxu0 %vm203_vm0, %v187_v22 }
  0xcc   :  { %v188_v23 = vpop.trf.xlu2 }
  0xcd   :  { %1295 = vmatmul.msk.f32.gmra.mxu0 %vm203_vm0, %v188_v23 }
  0xce   :  { %v478_v24 = vpop.trf.xlu0  ;;  %v623_v25 = vpop.trf.xlu1 }
  0xcf   :  { %1326 = vmatmul.msk.f32.vlgmr.msra.gmra.mxu2 %vm203_vm0, %v478_v24  ;;  %1342 = vmatmul.msk.f32.vlgmr.msra.gmra.mxu3 %vm203_vm0, %v623_v25 }
  0xd4   :  { %v189_v26 = vpop.trf.xlu2 }
  0xd5   :  { %1296 = vmatmul.msk.f32.gmra.mxu0 %vm203_vm0, %v189_v26 }
  0xd6   :  { %v479_v27 = vpop.trf.xlu0  ;;  %v624_v28 = vpop.trf.xlu1 }
  0xd7   :  { %1327 = vmatmul.msk.f32.gmra.mxu2 %vm203_vm0, %v479_v27  ;;  %1343 = vmatmul.msk.f32.gmra.mxu3 %vm203_vm0, %v624_v28 }
  0xdc   :  { %v190_v29 = vpop.trf.xlu2 }
  0xdd   :  { %1297 = vmatmul.msk.f32.gmra.mxu0 %vm203_vm0, %v190_v29 }
  0xde   :  { %v480_v30 = vpop.trf.xlu0  ;;  %v625_v31 = vpop.trf.xlu1 }
  0xdf   :  { %1328 = vmatmul.msk.f32.gmra.mxu2 %vm203_vm0, %v480_v30  ;;  %1344 = vmatmul.msk.f32.gmra.mxu3 %vm203_vm0, %v625_v31 }
  0xe4   :  { %v191_v32 = vpop.trf.xlu2 }
  0xe5   :  { %1298 = vmatmul.msk.f32.gmra.mxu0 %vm203_vm0, %v191_v32 }
  0xe6   :  { %v481_v33 = vpop.trf.xlu0  ;;  %v626_v34 = vpop.trf.xlu1 }
  0xe7   :  { %1329 = vmatmul.msk.f32.gmra.mxu2 %vm203_vm0, %v481_v33  ;;  %1345 = vmatmul.msk.f32.gmra.mxu3 %vm203_vm0, %v626_v34 }
  0xec   :  { %v192_v35 = vpop.trf.xlu2 }
  0xed   :  { %1299 = vmatmul.msk.f32.gmra.mxu0 %vm203_vm0, %v192_v35 }
  0xee   :  { %v482_v36 = vpop.trf.xlu0  ;;  %v627_v37 = vpop.trf.xlu1 }
  0xef   :  { %1330 = vmatmul.msk.f32.gmra.mxu2 %vm203_vm0, %v482_v36  ;;  %1346 = vmatmul.msk.f32.gmra.mxu3 %vm203_vm0, %v627_v37 }
  0xf4   :  { %v193_v38 = vpop.trf.xlu2 }
  0xf5   :  { %1300 = vmatmul.msk.f32.gmra.mxu0 %vm203_vm0, %v193_v38 }
  0xf6   :  { %v483_v39 = vpop.trf.xlu0  ;;  %v628_v40 = vpop.trf.xlu1 }
  0xf7   :  { %1331 = vmatmul.msk.f32.gmra.mxu2 %vm203_vm0, %v483_v39  ;;  %1347 = vmatmul.msk.f32.gmra.mxu3 %vm203_vm0, %v628_v40 }
  0xfc   :  { %v194_v41 = vpop.trf.xlu2 }
  0xfd   :  { %1301 = vmatmul.msk.f32.gmra.mxu0 %vm203_vm0, %v194_v41 }
  0xfe   :  { %v484_v42 = vpop.trf.xlu0  ;;  %v629_v43 = vpop.trf.xlu1 }
  0xff   :  { %1332 = vmatmul.msk.f32.gmra.mxu2 %vm203_vm0, %v484_v42  ;;  %1348 = vmatmul.msk.f32.gmra.mxu3 %vm203_vm0, %v629_v43 }
 0x104   :  { %v195_v44 = vpop.trf.xlu2 }
 0x105   :  { %1302 = vmatmul.msk.f32.gmra.mxu0 %vm203_vm0, %v195_v44 }
 0x106   :  { %v485_v45 = vpop.trf.xlu0  ;;  %v630_v46 = vpop.trf.xlu1 }
 0x107   :  { %1333 = vmatmul.msk.f32.gmra.mxu2 %vm203_vm0, %v485_v45  ;;  %1349 = vmatmul.msk.f32.gmra.mxu3 %vm203_vm0, %v630_v46 }
 0x10c   :  { %v196_v47 = vpop.trf.xlu2 }
 0x10d   :  { %1303 = vmatmul.msk.f32.gmra.mxu0 %vm203_vm0, %v196_v47 }
 0x10e   :  { %v486_v48 = vpop.trf.xlu0  ;;  %v631_v49 = vpop.trf.xlu1 }
 0x10f   :  { %1334 = vmatmul.msk.f32.gmra.mxu2 %vm203_vm0, %v486_v48  ;;  %1350 = vmatmul.msk.f32.gmra.mxu3 %vm203_vm0, %v631_v49 }
 0x114   :  { %v197_v50 = vpop.trf.xlu2 }
 0x115   :  { %1304 = vmatmul.msk.f32.gmra.mxu0 %vm203_vm0, %v197_v50 }
 0x116   :  { %v487_v51 = vpop.trf.xlu0  ;;  %v632_v52 = vpop.trf.xlu1 }
 0x117   :  { %1335 = vmatmul.msk.f32.gmra.mxu2 %vm203_vm0, %v487_v51  ;;  %1351 = vmatmul.msk.f32.gmra.mxu3 %vm203_vm0, %v632_v52 }
 0x11c   :  { %v198_v53 = vpop.trf.xlu2 }
 0x11d   :  { %1305 = vmatmul.msk.f32.gmra.mxu0 %vm203_vm0, %v198_v53 }
 0x11e   :  { %v488_v54 = vpop.trf.xlu0  ;;  %v633_v55 = vpop.trf.xlu1 }
 0x11f   :  { %1336 = vmatmul.msk.f32.gmra.mxu2 %vm203_vm0, %v488_v54  ;;  %1352 = vmatmul.msk.f32.gmra.mxu3 %vm203_vm0, %v633_v55 }
 0x124   :  { %v199_v56 = vpop.trf.xlu2 }
 0x125   :  { %1306 = vmatmul.msk.f32.gmra.mxu0 %vm203_vm0, %v199_v56 }
 0x126   :  { %v489_v57 = vpop.trf.xlu0  ;;  %v634_v58 = vpop.trf.xlu1 }
 0x127   :  { %1337 = vmatmul.msk.f32.gmra.mxu2 %vm203_vm0, %v489_v57  ;;  %1353 = vmatmul.msk.f32.gmra.mxu3 %vm203_vm0, %v634_v58 }
 0x12c   :  { %v200_v61 = vpop.trf.xlu2 }
 0x12d   :  { %1307 = vmatmul.msk.f32.gmra.mxu0 %vm203_vm0, %v200_v61 }
 0x12e   :  { %v490_v62 = vpop.trf.xlu0  ;;  %v635_v63 = vpop.trf.xlu1 }
 0x12f   :  { %1338 = vmatmul.msk.f32.gmra.mxu2 %vm203_vm0, %v490_v62  ;;  %1354 = vmatmul.msk.f32.gmra.mxu3 %vm203_vm0, %v635_v63 }
 0x134   :  { %v201_v0 = vpop.trf.xlu2 }
 0x135   :  { %1308 = vmatmul.msk.f32.gmra.mxu0 %vm203_vm0, %v201_v0 }
 0x136   :  { %v491_v1 = vpop.trf.xlu0  ;;  %v636_v2 = vpop.trf.xlu1 }
 0x137   :  { %1339 = vmatmul.msk.f32.gmra.mxu2 %vm203_vm0, %v491_v1  ;;  %1355 = vmatmul.msk.f32.gmra.mxu3 %vm203_vm0, %v636_v2 }
 0x13e   :  { %v492_v3 = vpop.trf.xlu0  ;;  %v637_v15 = vpop.trf.xlu1 }
 0x13f   :  { %1340 = vmatmul.msk.f32.gmra.mxu2 %vm203_vm0, %v492_v3  ;;  %1356 = vmatmul.msk.f32.gmra.mxu3 %vm203_vm0, %v637_v15 }
 0x142   :  { %v1654_v4 = vpop.f32.mrf.mxu0 }
 0x143   :  { %2280 = vst [vmem:[#allocation18_spill] sm:$0xff] %v1654_v4 }
 0x146   :  { %v493_v5 = vpop.trf.xlu0  ;;  %v638_v20 = vpop.trf.xlu1 }
 0x147   :  { %1341 = vmatmul.msk.f32.gmra.mxu2 %vm203_vm0, %v493_v5  ;;  %1357 = vmatmul.msk.f32.gmra.mxu3 %vm203_vm0, %v638_v20 }
 0x14a   :  { %v1657_v6 = vpop.f32.mrf.mxu0 }
 0x14b   :  { %2281 = vst [vmem:[#allocation19_spill] sm:$0xff] %v1657_v6 }
 0x14e   :  { %v333_v7 = vpop.trf.xlu0 }
 0x14f   :  { %1310 = vmatmul.msk.f32.vlgmr.msra.gmra.mxu1 %vm203_vm0, %v333_v7 }
 0x152   :  { %v1660_v8 = vpop.f32.mrf.mxu2  ;;  %v1662_v9 = vpop.f32.mrf.mxu3 }
 0x153   :  { %2282 = vst [vmem:[#allocation20_spill] sm:$0xff] %v1662_v9  ;;  %v1664_v10 = vpop.f32.mrf.mxu0 }
 0x154   :  { %2283 = vst [vmem:[#allocation21_spill] sm:$0xff] %v1664_v10 }
 0x156   :  { %v334_v11 = vpop.trf.xlu0 }
 0x157   :  { %1311 = vmatmul.msk.f32.gmra.mxu1 %vm203_vm0, %v334_v11  ;;  %v202_v11 = vpop.trf.xlu2 }
 0x158   :  { %1309 = vmatmul.msk.f32.gmra.mxu0 %vm203_vm0, %v202_v11 }
 0x15a   :  { %v1667_v12 = vpop.f32.mrf.mxu2  ;;  %v1669_v13 = vpop.f32.mrf.mxu3 }
 0x15b   :  { %2284 = vst [vmem:[#allocation22_spill] sm:$0xff] %v1667_v12  ;;  %v1671_v14 = vpop.f32.mrf.mxu0 }
 0x15e   :  { %v335_v16 = vpop.trf.xlu0 }
 0x15f   :  { %1312 = vmatmul.msk.f32.gmra.mxu1 %vm203_vm0, %v335_v16 }
 0x162   :  { %v1675_v17 = vpop.f32.mrf.mxu2  ;;  %v1677_v18 = vpop.f32.mrf.mxu3 }
 0x163   :  { %2285 = vst [vmem:[#allocation23_spill] sm:$0xff] %v1675_v17  ;;  %v1679_v19 = vpop.f32.mrf.mxu0 }
 0x164   :  { %2286 = vst [vmem:[#allocation24_spill] sm:$0xff] %v1677_v18 }
 0x165   :  { %2287 = vst [vmem:[#allocation25_spill] sm:$0xff] %v1679_v19 }
 0x166   :  { %v336_v21 = vpop.trf.xlu0 }
 0x167   :  { %1313 = vmatmul.msk.f32.gmra.mxu1 %vm203_vm0, %v336_v21 }
 0x16a   :  { %v1683_v22 = vpop.f32.mrf.mxu2  ;;  %v1685_v23 = vpop.f32.mrf.mxu3 }
 0x16b   :  { %2288 = vst [vmem:[#allocation26_spill] sm:$0xff] %v1683_v22  ;;  %v1687_v24 = vpop.f32.mrf.mxu0 }
 0x16c   :  { %2289 = vst [vmem:[#allocation27_spill] sm:$0xff] %v1685_v23 }
 0x16d   :  { %2290 = vst [vmem:[#allocation28_spill] sm:$0xff] %v1687_v24 }
 0x16e   :  { %v337_v25 = vpop.trf.xlu0 }
 0x16f   :  { %1314 = vmatmul.msk.f32.gmra.mxu1 %vm203_vm0, %v337_v25 }
 0x172   :  { %v1690_v26 = vpop.f32.mrf.mxu2  ;;  %v1692_v27 = vpop.f32.mrf.mxu3 }
 0x173   :  { %2291 = vst [vmem:[#allocation29_spill] sm:$0xff] %v1690_v26  ;;  %v1694_v28 = vpop.f32.mrf.mxu0 }
 0x174   :  { %2292 = vst [vmem:[#allocation30_spill] sm:$0xff] %v1692_v27 }
 0x175   :  { %2293 = vst [vmem:[#allocation31_spill] sm:$0xff] %v1694_v28 }
 0x176   :  { %v338_v29 = vpop.trf.xlu0 }
 0x177   :  { %1315 = vmatmul.msk.f32.gmra.mxu1 %vm203_vm0, %v338_v29 }
 0x17a   :  { %v1697_v30 = vpop.f32.mrf.mxu2  ;;  %v1699_v31 = vpop.f32.mrf.mxu3 }
 0x17b   :  { %2294 = vst [vmem:[#allocation32_spill] sm:$0xff] %v1697_v30  ;;  %v1701_v32 = vpop.f32.mrf.mxu0 }
 0x17c   :  { %2295 = vst [vmem:[#allocation33_spill] sm:$0xff] %v1699_v31 }
 0x17e   :  { %v339_v33 = vpop.trf.xlu0 }
 0x17f   :  { %1316 = vmatmul.msk.f32.gmra.mxu1 %vm203_vm0, %v339_v33 }
 0x182   :  { %v1704_v34 = vpop.f32.mrf.mxu2  ;;  %v1706_v35 = vpop.f32.mrf.mxu3 }
 0x183   :  { %2296 = vst [vmem:[#allocation34_spill] sm:$0xff] %v1704_v34  ;;  %v1708_v36 = vpop.f32.mrf.mxu0 }
 0x184   :  { %2297 = vst [vmem:[#allocation35_spill] sm:$0xff] %v1706_v35 }
 0x186   :  { %v340_v37 = vpop.trf.xlu0 }
 0x187   :  { %1317 = vmatmul.msk.f32.gmra.mxu1 %vm203_vm0, %v340_v37 }
 0x18a   :  { %v1711_v38 = vpop.f32.mrf.mxu2  ;;  %v1713_v39 = vpop.f32.mrf.mxu3 }
 0x18b   :  { %2298 = vst [vmem:[#allocation36_spill] sm:$0xff] %v1711_v38  ;;  %v1715_v40 = vpop.f32.mrf.mxu0 }
 0x18c   :  { %2299 = vst [vmem:[#allocation37_spill] sm:$0xff] %v1713_v39 }
 0x18e   :  { %v341_v41 = vpop.trf.xlu0 }
 0x18f   :  { %1318 = vmatmul.msk.f32.gmra.mxu1 %vm203_vm0, %v341_v41 }
 0x192   :  { %v1718_v42 = vpop.f32.mrf.mxu2  ;;  %v1720_v43 = vpop.f32.mrf.mxu3 }
 0x193   :  { %2300 = vst [vmem:[#allocation38_spill] sm:$0xff] %v1718_v42  ;;  %v1723_v45 = vpop.f32.mrf.mxu0 }
 0x196   :  { %v342_v44 = vpop.trf.xlu0 }
 0x197   :  { %1319 = vmatmul.msk.f32.gmra.mxu1 %vm203_vm0, %v342_v44 }
 0x19a   :  { %v1725_v46 = vpop.f32.mrf.mxu2  ;;  %v1727_v47 = vpop.f32.mrf.mxu3 }
 0x19b   :  { %v1730_v49 = vpop.f32.mrf.mxu0 }
 0x19e   :  { %v343_v48 = vpop.trf.xlu0 }
 0x19f   :  { %1320 = vmatmul.msk.f32.gmra.mxu1 %vm203_vm0, %v343_v48 }
 0x1a2   :  { %v1732_v50 = vpop.f32.mrf.mxu2  ;;  %v1734_v51 = vpop.f32.mrf.mxu3 }
 0x1a3   :  { %v1741_v55 = vpop.f32.mrf.mxu0 }
 0x1a6   :  { %v344_v52 = vpop.trf.xlu0 }
 0x1a7   :  { %1321 = vmatmul.msk.f32.gmra.mxu1 %vm203_vm0, %v344_v52 }
 0x1aa   :  { %v1737_v53 = vpop.f32.mrf.mxu2  ;;  %v1739_v54 = vpop.f32.mrf.mxu3 }
 0x1ab   :  { %v1748_v60 = vpop.f32.mrf.mxu0 }
 0x1ae   :  { %v345_v56 = vpop.trf.xlu0 }
 0x1af   :  { %1322 = vmatmul.msk.f32.gmra.mxu1 %vm203_vm0, %v345_v56 }
 0x1b2   :  { %v1744_v57 = vpop.f32.mrf.mxu2  ;;  %v1746_v58 = vpop.f32.mrf.mxu3 }
 0x1b3   :  { %v1758_v0 = vpop.f32.mrf.mxu0 }
 0x1b6   :  { %v346_v59 = vpop.trf.xlu0 }
 0x1b7   :  { %1323 = vmatmul.msk.f32.gmra.mxu1 %vm203_vm0, %v346_v59 }
 0x1ba   :  { %v1751_v61 = vpop.f32.mrf.mxu2  ;;  %v1753_v62 = vpop.f32.mrf.mxu3 }
 0x1bb   :  { %842 = vmax.xlane.f32.xlu2 %v1751_v61  ;;  %874 = vmax.xlane.f32.xlu1 %v1753_v62 }
 0x1be   :  { %v347_v63 = vpop.trf.xlu0 }
 0x1bf   :  { %1324 = vmatmul.msk.f32.gmra.mxu1 %vm203_vm0, %v347_v63 }
 0x1c2   :  { %v1760_v1 = vpop.f32.mrf.mxu2  ;;  %v1789_v25 = vpop.f32.mrf.mxu3 }
 0x1c3   :  { %844 = vmax.xlane.f32.xlu0 %v1760_v1  ;;  %780 = vmax.xlane.f32.xlu2 %v1758_v0 }
 0x1c6   :  { %v348_v16 = vpop.trf.xlu0 }
 0x1c7   :  { %1325 = vmatmul.msk.f32.gmra.mxu1 %vm203_vm0, %v348_v16 }
 0x1ca   :  { %v749_v33 = vpop.f32.mrf.mxu3 }
 0x1cb   :  { %826 = vmax.xlane.f32.xlu0 %v1697_v30  ;;  %840 = vmax.xlane.f32.xlu2 %v1744_v57 }
 0x1cc   :  { %v1766_v2 = vpop.f32.mrf.mxu1 }
 0x1cd   :  { %2301 = vst [vmem:[#allocation39_spill] sm:$0xff] %v1766_v2 }
 0x1d3   :  { %778 = vmax.xlane.f32.xlu2 %v1748_v60 }
 0x1d4   :  { %v1769_v3 = vpop.f32.mrf.mxu1 }
 0x1db   :  { %838 = vmax.xlane.f32.xlu2 %v1737_v53 }
 0x1dc   :  { %v1772_v5 = vpop.f32.mrf.mxu1 }
 0x1dd   :  { %2302 = vst [vmem:[#allocation40_spill] sm:$0xff] %v1772_v5 }
 0x1e3   :  { %776 = vmax.xlane.f32.xlu2 %v1741_v55 }
 0x1e4   :  { %v1775_v7 = vpop.f32.mrf.mxu1 }
 0x1e5   :  { %2303 = vst [vmem:[#allocation41_spill] sm:$0xff] %v1775_v7 }
 0x1eb   :  { %836 = vmax.xlane.f32.xlu2 %v1732_v50 }
 0x1ec   :  { %v1779_v15 = vpop.f32.mrf.mxu1 }
 0x1ed   :  { %2304 = vst [vmem:[#allocation42_spill] sm:$0xff] %v1779_v15 }
 0x1f3   :  { %774 = vmax.xlane.f32.xlu2 %v1730_v49 }
 0x1f4   :  { %v1783_v20 = vpop.f32.mrf.mxu1 }
 0x1f5   :  { %2305 = vst [vmem:[#allocation43_spill] sm:$0xff] %v1783_v20 }
 0x1fb   :  { %834 = vmax.xlane.f32.xlu2 %v1725_v46 }
 0x1fc   :  { %v1786_v21 = vpop.f32.mrf.mxu1 }
 0x1fd   :  { %2306 = vst [vmem:[#allocation44_spill] sm:$0xff] %v1786_v21  ;;  %796 = vmax.xlane.f32.xlu0 %v1786_v21  ;;  %v314_v21 = vpop.f32.mrf.mxu0 }
 0x203   :  { %772 = vmax.xlane.f32.xlu2 %v1723_v45 }
 0x204   :  { %v1792_v29 = vpop.f32.mrf.mxu1 }
 0x205   :  { %2307 = vst [vmem:[#allocation45_spill] sm:$0xff] %v1792_v29  ;;  %762 = vmax.xlane.f32.xlu0 %v1687_v24 }
 0x20b   :  { %878 = vmax.xlane.f32.xlu2 %v749_v33 }
 0x20c   :  { %v1795_v37 = vpop.f32.mrf.mxu1 }
 0x20d   :  { %2308 = vst [vmem:[#allocation46_spill] sm:$0xff] %v1795_v37  ;;  %854 = vmax.xlane.f32.xlu0 %v1685_v23 }
 0x213   :  { %832 = vmax.xlane.f32.xlu2 %v1718_v42 }
 0x214   :  { %v1799_v41 = vpop.f32.mrf.mxu1 }
 0x215   :  { %2309 = vst [vmem:[#allocation47_spill] sm:$0xff] %v1799_v41  ;;  %820 = vmax.xlane.f32.xlu0 %v1675_v17 }
 0x21b   :  { %770 = vmax.xlane.f32.xlu2 %v1715_v40 }
 0x21c   :  { %v1803_v44 = vpop.f32.mrf.mxu1 }
 0x21d   :  { %790 = vmax.xlane.f32.xlu0 %v1775_v7 }
 0x223   :  { %830 = vmax.xlane.f32.xlu2 %v1711_v38 }
 0x224   :  { %v1807_v48 = vpop.f32.mrf.mxu1 }
 0x225   :  { %756 = vmax.xlane.f32.xlu0 %v1664_v10 }
 0x22b   :  { %768 = vmax.xlane.f32.xlu2 %v1708_v36 }
 0x22c   :  { %v1811_v52 = vpop.f32.mrf.mxu1 }
 0x22d   :  { %848 = vmax.xlane.f32.xlu0 %v1662_v9 }
 0x22e   :  { %v1814_v56 = vpop.xlane.xlu2 %842 }
 0x233   :  { %828 = vmax.xlane.f32.xlu2 %v1704_v34 }
 0x234   :  { %v1817_v59 = vpop.f32.mrf.mxu1 }
 0x235   :  { %752 = vmax.xlane.f32.xlu0 %v1654_v4 }
 0x236   :  { %v1820_v63 = vpop.xlane.xlu2 %780 }
 0x23b   :  { %766 = vmax.xlane.f32.xlu2 %v1701_v32 }
 0x23c   :  { %v1823_v11 = vpop.f32.mrf.mxu1 }
 0x23d   :  { %812 = vmax.xlane.f32.xlu1 %v1823_v11 }
 0x23e   :  { %v1826_v16 = vpop.xlane.xlu2 %840 }
 0x243   :  { %858 = vmax.xlane.f32.xlu2 %v1699_v31 }
 0x244   :  { %v1861_v31 = vpop.f32.mrf.mxu1 }
 0x245   :  { %872 = vmax.xlane.f32.xlu1 %v1746_v58 }
 0x246   :  { %v1830_v9 = vpop.xlane.xlu2 %778 }
 0x24b   :  { %824 = vmax.xlane.f32.xlu2 %v1690_v26 }
 0x24d   :  { %810 = vmax.xlane.f32.xlu1 %v1817_v59 }
 0x24e   :  { %v1834_v4 = vpop.xlane.xlu2 %838 }
 0x253   :  { %794 = vmax.xlane.f32.xlu2 %v1783_v20 }
 0x255   :  { %870 = vmax.xlane.f32.xlu1 %v1739_v54 }
 0x256   :  { %v1838_v10 = vpop.xlane.xlu2 %776 }
 0x25b   :  { %760 = vmax.xlane.f32.xlu2 %v1679_v19 }
 0x25d   :  { %808 = vmax.xlane.f32.xlu1 %v1811_v52 }
 0x25e   :  { %v1842_v7 = vpop.xlane.xlu2 %836 }
 0x263   :  { %852 = vmax.xlane.f32.xlu2 %v1677_v18 }
 0x265   :  { %868 = vmax.xlane.f32.xlu1 %v1734_v51 }
 0x266   :  { %v1846_v17 = vpop.xlane.xlu2 %774 }
 0x26b   :  { %818 = vmax.xlane.f32.xlu2 %v1667_v12 }
 0x26d   :  { %806 = vmax.xlane.f32.xlu1 %v1807_v48 }
 0x26e   :  { %v1850_v23 = vpop.xlane.xlu2 %834 }
 0x273   :  { %788 = vmax.xlane.f32.xlu2 %v1772_v5  ;;  %v1865_v5 = vpop.f32.mrf.mxu2 }
 0x275   :  { %866 = vmax.xlane.f32.xlu1 %v1727_v47 }
 0x276   :  { %v1854_v19 = vpop.xlane.xlu2 %772 }
 0x27b   :  { %754 = vmax.xlane.f32.xlu2 %v1657_v6 }
 0x27d   :  { %876 = vmax.xlane.f32.xlu1 %v1789_v25 }
 0x27e   :  { %v879_v18 = vpop.xlane.xlu2 %878 }
 0x27f   :  { %v943_v24 = vsub.f32 %v749_v33, %v879_v18  ;;  %v875_v18 = vpop.xlane.xlu1 %874 }
 0x281   :  { %v1070_v20 = vmul.f32 1.442695, %v943_v24 }
 0x283   :  { %1387 = vpow2.f32 %v1070_v20  ;;  %784 = vmax.xlane.f32.xlu2 %v1766_v2 }
 0x285   :  { %782 = vmax.xlane.f32.xlu1 %v314_v21 }
 0x286   :  { %v1883_v26 = vpop.xlane.xlu2 %832 }
 0x287   :  { %2311 = vst [vmem:[#allocation49_spill] sm:$0xff] %v1883_v26 }
 0x289   :  { %v1859_v12 = vpop.eup %1387 }
 0x28a   :  { %2310 = vst [vmem:[#allocation48_spill] sm:$0xff] %v1859_v12  ;;  %1141 = vmatpush.xpose.msrb.mxu3 %v1859_v12 }
 0x28d   :  { %814 = vmax.xlane.f32.xlu1 %v1861_v31 }
 0x28e   :  { %v1888_v34 = vpop.xlane.xlu2 %770 }
 0x295   :  { %846 = vmax.xlane.f32.xlu1 %v1865_v5 }
 0x29d   :  { %804 = vmax.xlane.f32.xlu1 %v1803_v44 }
 0x2a5   :  { %864 = vmax.xlane.f32.xlu1 %v1720_v43 }
 0x2ad   :  { %802 = vmax.xlane.f32.xlu1 %v1799_v41 }
 0x2b0   :  { %v1871_v24 = vpop.xlane.xlu1 %812 }
 0x2b5   :  { %862 = vmax.xlane.f32.xlu1 %v1713_v39 }
 0x2b8   :  { %v873_v20 = vpop.xlane.xlu1 %872 }
 0x2bd   :  { %800 = vmax.xlane.f32.xlu1 %v1795_v37 }
 0x2c0   :  { %v1875_v33 = vpop.xlane.xlu1 %810 }
 0x2c5   :  { %860 = vmax.xlane.f32.xlu1 %v1706_v35 }
 0x2c8   :  { %v871_v12 = vpop.xlane.xlu1 %870 }
 0x2cd   :  { %798 = vmax.xlane.f32.xlu1 %v1792_v29  ;;  %v941_v29 = vsub.f32 %v1753_v62, %v875_v18 }
 0x2cf   :  { %v1066_v42 = vmul.f32 1.442695, %v941_v29 }
 0x2d0   :  { %v1879_v2 = vpop.xlane.xlu1 %808 }
 0x2d5   :  { %764 = vmax.xlane.f32.xlu1 %v1694_v28  ;;  %v1893_v28 = vpop.xlane.xlu2 %830 }
 0x2d8   :  { %v869_v6 = vpop.xlane.xlu1 %868 }
 0x2dd   :  { %856 = vmax.xlane.f32.xlu1 %v1692_v27  ;;  %v940_v27 = vsub.f32 %v1746_v58, %v873_v20 }
 0x2df   :  { %v1064_v26 = vmul.f32 1.442695, %v940_v27  ;;  %v938_v27 = vsub.f32 %v1734_v51, %v869_v6 }
 0x2e0   :  { %v1885_v30 = vpop.xlane.xlu1 %806 }
 0x2e5   :  { %822 = vmax.xlane.f32.xlu1 %v1683_v22  ;;  %v894_v22 = vsub.f32 %v1758_v0, %v1820_v63  ;;  %v1060_v0 = vmul.f32 1.442695, %v938_v27 }
 0x2e8   :  { %v867_v37 = vpop.xlane.xlu1 %866 }
 0x2e9   :  { %v937_v6 = vsub.f32 %v1727_v47, %v867_v37 }
 0x2eb   :  { %v1058_v29 = vmul.f32 1.442695, %v937_v6 }
 0x2ed   :  { %792 = vmax.xlane.f32.xlu1 %v1779_v15  ;;  %v939_v15 = vsub.f32 %v1739_v54, %v871_v12 }
 0x2ef   :  { %v1062_v58 = vmul.f32 1.442695, %v939_v15  ;;  %v891_v15 = vsub.f32 %v1730_v49, %v1846_v17  ;;  %v845_v17 = vpop.xlane.xlu0 %844 }
 0x2f0   :  { %v877_v35 = vpop.xlane.xlu1 %876 }
 0x2f1   :  { %v942_v39 = vsub.f32 %v1789_v25, %v877_v35  ;;  %v972_v25 = vmul.f32 1.442695, %v894_v22  ;;  %v892_v22 = vsub.f32 %v1741_v55, %v1838_v10  ;;  %v966_v49 = vmul.f32 1.442695, %v891_v15 }
 0x2f3   :  { %v1068_v38 = vmul.f32 1.442695, %v942_v39  ;;  %v893_v39 = vsub.f32 %v1748_v60, %v1830_v9  ;;  %v910_v9 = vsub.f32 %v1823_v11, %v1871_v24  ;;  %v968_v55 = vmul.f32 1.442695, %v892_v22 }
 0x2f4   :  { %v908_v24 = vsub.f32 %v1811_v52, %v1879_v2  ;;  %v925_v52 = vsub.f32 %v1751_v61, %v1814_v56 }
 0x2f5   :  { %1389 = vpow2.f32 %v1068_v38  ;;  %758 = vmax.xlane.f32.xlu1 %v1671_v14  ;;  %v1905_v38 = vpop.xlane.xlu2 %768 }
 0x2f6   :  { %1391 = vpow2.f32 %v1066_v42  ;;  %v970_v42 = vmul.f32 1.442695, %v893_v39  ;;  %v889_v39 = vsub.f32 %v1715_v40, %v1888_v34  ;;  %v1000_v2 = vmul.f32 1.442695, %v908_v24 }
 0x2f7   :  { %1393 = vpow2.f32 %v1064_v26 }
 0x2f8   :  { %v783_v41 = vpop.xlane.xlu1 %782  ;;  %v962_v27 = vmul.f32 1.442695, %v889_v39  ;;  %v2313_v39 = vld [vmem:[#allocation49_spill] sm:$0xff] }
 0x2f9   :  { %v895_v62 = vsub.f32 %v314_v21, %v783_v41  ;;  %v909_v21 = vsub.f32 %v1817_v59, %v1875_v33  ;;  %v890_v59 = vsub.f32 %v1723_v45, %v1854_v19 }
 0x2fb   :  { %v1900_v18 = vpop.eup %1389  ;;  %v974_v35 = vmul.f32 1.442695, %v895_v62  ;;  %v1002_v63 = vmul.f32 1.442695, %v909_v21  ;;  %v926_v62 = vsub.f32 %v1760_v1, %v845_v17  ;;  %v907_v1 = vsub.f32 %v1807_v48, %v1885_v30 }
 0x2fc   :  { %1142 = vmatpush.xpose.msrb.mxu3 %v1900_v18  ;;  %v1909_v12 = vpop.eup %1391  ;;  %v888_v30 = vsub.f32 %v1708_v36, %v1905_v38  ;;  %v924_v36 = vsub.f32 %v1744_v57, %v1826_v16  ;;  %v923_v57 = vsub.f32 %v1737_v53, %v1834_v4  ;;  %v922_v53 = vsub.f32 %v1732_v50, %v1842_v7 }
 0x2fd   :  { %1395 = vpow2.f32 %v974_v35  ;;  %850 = vmax.xlane.f32.xlu1 %v1669_v13  ;;  %v1917_v60 = vpop.eup %1393  ;;  %v1933_v41 = vpop.xlane.xlu2 %828  ;;  %v1036_v34 = vmul.f32 1.442695, %v926_v62  ;;  %v998_v61 = vmul.f32 1.442695, %v907_v1  ;;  %v921_v50 = vsub.f32 %v1725_v46, %v1850_v23  ;;  %v2314_v23 = vld [vmem:[#allocation38_spill] sm:$0xff] }
 0x2fe   :  { %1397 = vpow2.f32 %v972_v25  ;;  %v964_v25 = vmul.f32 1.442695, %v890_v59  ;;  %v1032_v15 = vmul.f32 1.442695, %v924_v36  ;;  %v1030_v4 = vmul.f32 1.442695, %v923_v57 }
 0x2ff   :  { %1399 = vpow2.f32 %v1062_v58  ;;  %v1028_v59 = vmul.f32 1.442695, %v922_v53  ;;  %v920_v46 = vsub.f32 %v2314_v23, %v2313_v39 }
 0x300   :  { %v815_v54 = vpop.xlane.xlu1 %814  ;;  %1143 = vmatpush.xpose.msrb.mxu3 %v1909_v12  ;;  %1401 = vpow2.f32 %v970_v42 }
 0x301   :  { %v911_v26 = vsub.f32 %v1861_v31, %v815_v54  ;;  %v1004_v31 = vmul.f32 1.442695, %v910_v9  ;;  %v1034_v9 = vmul.f32 1.442695, %v925_v52 }
 0x303   :  { %v1920_v51 = vpop.eup %1395  ;;  %v1006_v10 = vmul.f32 1.442695, %v911_v26  ;;  %v960_v26 = vmul.f32 1.442695, %v888_v30  ;;  %v2315_v30 = vld [vmem:[#allocation36_spill] sm:$0xff] }
 0x304   :  { %1072 = vmatpush.xpose.msrb.mxu0 %v1920_v51  ;;  %1144 = vmatpush.xpose.msrb.mxu3 %v1917_v60  ;;  %v1929_v47 = vpop.eup %1397 }
 0x305   :  { %1403 = vpow2.f32 %v1006_v10  ;;  %816 = vmax.xlane.f32.xlu1 %v1660_v8  ;;  %v1931_v37 = vpop.eup %1399  ;;  %v767_v22 = vpop.xlane.xlu2 %766 }
 0x306   :  { %1405 = vpow2.f32 %v1060_v0  ;;  %v1942_v33 = vpop.eup %1401  ;;  %v887_v0 = vsub.f32 %v1701_v32, %v767_v22 }
 0x307   :  { %1407 = vpow2.f32 %v968_v55 }
 0x308   :  { %v847_v11 = vpop.xlane.xlu1 %846  ;;  %1073 = vmatpush.xpose.msrb.mxu0 %v1929_v47  ;;  %1145 = vmatpush.xpose.msrb.mxu3 %v1931_v37  ;;  %1409 = vpow2.f32 %v1004_v31  ;;  %v958_v32 = vmul.f32 1.442695, %v887_v0  ;;  %v2317_v0 = vld [vmem:[#allocation34_spill] sm:$0xff] }
 0x309   :  { %v927_v20 = vsub.f32 %v1865_v5, %v847_v11  ;;  %1411 = vpow2.f32 %v1058_v29  ;;  %v827_v11 = vpop.xlane.xlu0 %826 }
 0x30a   :  { %1413 = vpow2.f32 %v966_v49 }
 0x30b   :  { %v1945_v35 = vpop.eup %1403  ;;  %v1038_v19 = vmul.f32 1.442695, %v927_v20  ;;  %1415 = vpow2.f32 %v1002_v63  ;;  %v2312_v20 = vld [vmem:[#allocation47_spill] sm:$0xff] }
 0x30c   :  { %v1947_v45 = vpop.eup %1405  ;;  %1074 = vmatpush.xpose.msrb.mxu0 %v1942_v33  ;;  %1095 = vmatpush.xpose.msrb.mxu1 %v1945_v35 }
 0x30d   :  { %1417 = vpow2.f32 %v1038_v19  ;;  %1146 = vmatpush.xpose.msrb.mxu3 %v1947_v45  ;;  %786 = vmax.xlane.f32.xlu1 %v1769_v3  ;;  %v1957_v5 = vpop.eup %1407  ;;  %v859_v1 = vpop.xlane.xlu2 %858 }
 0x30e   :  { %v1961_v40 = vpop.eup %1409  ;;  %1419 = vpow2.f32 %v964_v25  ;;  %v1026_v25 = vmul.f32 1.442695, %v921_v50 }
 0x30f   :  { %v1963_v58 = vpop.eup %1411  ;;  %1421 = vpow2.f32 %v1000_v2 }
 0x310   :  { %1096 = vmatpush.xpose.msrb.mxu1 %v1961_v40  ;;  %v805_v48 = vpop.xlane.xlu1 %804  ;;  %1075 = vmatpush.xpose.msrb.mxu0 %v1957_v5  ;;  %v1969_v42 = vpop.eup %1413  ;;  %1423 = vpow2.f32 %v1036_v34 }
 0x311   :  { %v906_v56 = vsub.f32 %v1803_v44, %v805_v48  ;;  %1147 = vmatpush.xpose.msrb.mxu3 %v1963_v58  ;;  %v1973_v54 = vpop.eup %1415  ;;  %1425 = vpow2.f32 %v962_v27  ;;  %v1024_v27 = vmul.f32 1.442695, %v920_v46  ;;  %v919_v48 = vsub.f32 %v2315_v30, %v1893_v28  ;;  %v2321_v30 = vld [vmem:[#allocation33_spill] sm:$0xff] }
 0x312   :  { %1427 = vpow2.f32 %v998_v61  ;;  %v797_v61 = vpop.xlane.xlu0 %796 }
 0x313   :  { %v1977_v38 = vpop.eup %1417  ;;  %v996_v44 = vmul.f32 1.442695, %v906_v56  ;;  %1429 = vpow2.f32 %v1034_v9  ;;  %v2316_v9 = vld [vmem:[#allocation37_spill] sm:$0xff] }
 0x314   :  { %1076 = vmatpush.xpose.msrb.mxu0 %v1969_v42  ;;  %1097 = vmatpush.xpose.msrb.mxu1 %v1973_v54  ;;  %v1983_v6 = vpop.eup %1419  ;;  %1431 = vpow2.f32 %v960_v26  ;;  %v1022_v26 = vmul.f32 1.442695, %v919_v48  ;;  %v933_v48 = vsub.f32 %v2321_v30, %v859_v1 }
 0x315   :  { %1118 = vmatpush.xpose.msrb.mxu2 %v1977_v38  ;;  %v1987_v16 = vpop.eup %1421  ;;  %1433 = vpow2.f32 %v996_v44  ;;  %v918_v44 = vsub.f32 %v2317_v0, %v1933_v41  ;;  %v825_v28 = vpop.xlane.xlu2 %824 }
 0x316   :  { %v1989_v10 = vpop.eup %1423  ;;  %1435 = vpow2.f32 %v1032_v15 }
 0x317   :  { %v1995_v31 = vpop.eup %1425  ;;  %1437 = vpow2.f32 %v958_v32 }
 0x318   :  { %1098 = vmatpush.xpose.msrb.mxu1 %v1987_v16  ;;  %v865_v55 = vpop.xlane.xlu1 %864  ;;  %1077 = vmatpush.xpose.msrb.mxu0 %v1983_v6  ;;  %v1999_v29 = vpop.eup %1427 }
 0x319   :  { %1119 = vmatpush.xpose.msrb.mxu2 %v1989_v10  ;;  %v936_v21 = vsub.f32 %v1720_v43, %v865_v55  ;;  %v2001_v49 = vpop.eup %1429  ;;  %v2318_v55 = vld [vmem:[#allocation32_spill] sm:$0xff] }
 0x31a   :  { %v2006_v43 = vpop.eup %1431 }
 0x31b   :  { %v1056_v17 = vmul.f32 1.442695, %v936_v21  ;;  %v2010_v7 = vpop.eup %1433  ;;  %v917_v21 = vsub.f32 %v2318_v55, %v827_v11  ;;  %v2324_v55 = vld [vmem:[#allocation44_spill] sm:$0xff] }
 0x31c   :  { %1078 = vmatpush.xpose.msrb.mxu0 %v1995_v31  ;;  %1099 = vmatpush.xpose.msrb.mxu1 %v1999_v29  ;;  %v2012_v63 = vpop.eup %1435 }
 0x31d   :  { %1439 = vpow2.f32 %v1056_v17  ;;  %1120 = vmatpush.xpose.msrb.mxu2 %v2001_v49  ;;  %v2018_v19 = vpop.eup %1437  ;;  %v1018_v50 = vmul.f32 1.442695, %v917_v21  ;;  %v795_v46 = vpop.xlane.xlu2 %794  ;;  %v902_v21 = vsub.f32 %v2324_v55, %v797_v61  ;;  %v2330_v55 = vld [vmem:[#allocation25_spill] sm:$0xff] }
 0x31e   :  { %1441 = vpow2.f32 %v1030_v4  ;;  %v1020_v4 = vmul.f32 1.442695, %v918_v44 }
 0x31f   :  { %1443 = vpow2.f32 %v1028_v59  ;;  %v2319_v59 = vld [vmem:[#allocation46_spill] sm:$0xff] }
 0x320   :  { %1100 = vmatpush.xpose.msrb.mxu1 %v2010_v7  ;;  %v803_v24 = vpop.xlane.xlu1 %802  ;;  %1079 = vmatpush.xpose.msrb.mxu0 %v2006_v43 }
 0x321   :  { %v905_v62 = vsub.f32 %v2312_v20, %v803_v24  ;;  %1121 = vmatpush.xpose.msrb.mxu2 %v2012_v63  ;;  %v763_v24 = vpop.xlane.xlu0 %762  ;;  %v2320_v20 = vld [vmem:[#allocation29_spill] sm:$0xff] }
 0x323   :  { %v2022_v2 = vpop.eup %1439  ;;  %v994_v52 = vmul.f32 1.442695, %v905_v62  ;;  %v916_v62 = vsub.f32 %v2320_v20, %v825_v28  ;;  %v2326_v20 = vld [vmem:[#allocation43_spill] sm:$0xff] }
 0x324   :  { %v2024_v34 = vpop.eup %1441  ;;  %1080 = vmatpush.xpose.msrb.mxu0 %v2018_v19  ;;  %1148 = vmatpush.xpose.msrb.mxu3 %v2022_v2 }
 0x325   :  { %1445 = vpow2.f32 %v994_v52  ;;  %1122 = vmatpush.xpose.msrb.mxu2 %v2024_v34  ;;  %v2031_v22 = vpop.eup %1443  ;;  %v1016_v11 = vmul.f32 1.442695, %v916_v62  ;;  %v901_v62 = vsub.f32 %v2326_v20, %v795_v46 }
 0x326   :  { %1447 = vpow2.f32 %v1026_v25 }
 0x327   :  { %1449 = vpow2.f32 %v1024_v27  ;;  %v986_v30 = vmul.f32 1.442695, %v901_v62  ;;  %v2332_v62 = vld [vmem:[#allocation27_spill] sm:$0xff] }
 0x328   :  { %v863_v56 = vpop.xlane.xlu1 %862 }
 0x329   :  { %v935_v36 = vsub.f32 %v2316_v9, %v863_v56  ;;  %1123 = vmatpush.xpose.msrb.mxu2 %v2031_v22  ;;  %v2322_v56 = vld [vmem:[#allocation35_spill] sm:$0xff]  ;;  %v855_v44 = vpop.xlane.xlu0 %854 }
 0x32b   :  { %v2037_v15 = vpop.eup %1445  ;;  %v1054_v57 = vmul.f32 1.442695, %v935_v36 }
 0x32c   :  { %v2039_v32 = vpop.eup %1447  ;;  %1101 = vmatpush.xpose.msrb.mxu1 %v2037_v15 }
 0x32d   :  { %1451 = vpow2.f32 %v1054_v57  ;;  %1124 = vmatpush.xpose.msrb.mxu2 %v2039_v32  ;;  %v2044_v53 = vpop.eup %1449  ;;  %v1050_v57 = vmul.f32 1.442695, %v933_v48  ;;  %v2327_v48 = vld [vmem:[#allocation28_spill] sm:$0xff] }
 0x32e   :  { %1453 = vpow2.f32 %v1022_v26 }
 0x32f   :  { %1455 = vpow2.f32 %v1020_v4  ;;  %v761_v4 = vpop.xlane.xlu2 %760 }
 0x330   :  { %v801_v17 = vpop.xlane.xlu1 %800 }
 0x331   :  { %v904_v41 = vsub.f32 %v2319_v59, %v801_v17  ;;  %1125 = vmatpush.xpose.msrb.mxu2 %v2044_v53  ;;  %v2325_v17 = vld [vmem:[#allocation45_spill] sm:$0xff] }
 0x333   :  { %v2049_v25 = vpop.eup %1451  ;;  %v992_v39 = vmul.f32 1.442695, %v904_v41 }
 0x334   :  { %v2051_v23 = vpop.eup %1453  ;;  %1149 = vmatpush.xpose.msrb.mxu3 %v2049_v25 }
 0x335   :  { %1457 = vpow2.f32 %v992_v39  ;;  %1126 = vmatpush.xpose.msrb.mxu2 %v2051_v23  ;;  %v2055_v52 = vpop.eup %1455  ;;  %v988_v39 = vmul.f32 1.442695, %v902_v21  ;;  %v884_v21 = vsub.f32 %v2330_v55, %v761_v4 }
 0x336   :  { %1459 = vpow2.f32 %v1018_v50 }
 0x337   :  { %1461 = vpow2.f32 %v1016_v11  ;;  %v821_v11 = vpop.xlane.xlu0 %820  ;;  %v952_v20 = vmul.f32 1.442695, %v884_v21 }
 0x338   :  { %v861_v27 = vpop.xlane.xlu1 %860 }
 0x339   :  { %v934_v9 = vsub.f32 %v2322_v56, %v861_v27  ;;  %1127 = vmatpush.xpose.msrb.mxu2 %v2055_v52  ;;  %v885_v56 = vsub.f32 %v2327_v48, %v763_v24 }
 0x33b   :  { %v2060_v36 = vpop.eup %1457  ;;  %v1052_v26 = vmul.f32 1.442695, %v934_v9  ;;  %v2328_v9 = vld [vmem:[#allocation31_spill] sm:$0xff] }
 0x33c   :  { %v2062_v0 = vpop.eup %1459  ;;  %1102 = vmatpush.xpose.msrb.mxu1 %v2060_v36 }
 0x33d   :  { %1463 = vpow2.f32 %v1052_v26  ;;  %1128 = vmatpush.xpose.msrb.mxu2 %v2062_v0  ;;  %v2066_v28 = vpop.eup %1461 }
 0x33e   :  { %2323 = vst [vmem:[#allocation47_spill] sm:$0xff] %v2066_v28  ;;  %1465 = vpow2.f32 %v1050_v57 }
 0x340   :  { %v799_v1 = vpop.xlane.xlu1 %798 }
 0x341   :  { %v903_v59 = vsub.f32 %v2325_v17, %v799_v1  ;;  %1129 = vmatpush.xpose.msrb.mxu2 %v2066_v28  ;;  %v853_v1 = vpop.xlane.xlu2 %852  ;;  %v954_v17 = vmul.f32 1.442695, %v885_v56  ;;  %v2335_v56 = vld [vmem:[#allocation24_spill] sm:$0xff] }
 0x343   :  { %v2071_v41 = vpop.eup %1463  ;;  %v990_v50 = vmul.f32 1.442695, %v903_v59 }
 0x344   :  { %1150 = vmatpush.xpose.msrb.mxu3 %v2071_v41  ;;  %v2075_v27 = vpop.eup %1465 }
 0x345   :  { %1467 = vpow2.f32 %v990_v50  ;;  %v791_v50 = vpop.xlane.xlu0 %790 }
 0x346   :  { %1469 = vpow2.f32 %v988_v39  ;;  %v931_v39 = vsub.f32 %v2332_v62, %v855_v44 }
 0x347   :  { %1471 = vpow2.f32 %v986_v30 }
 0x348   :  { %v765_v61 = vpop.xlane.xlu1 %764  ;;  %1151 = vmatpush.xpose.msrb.mxu3 %v2075_v27 }
 0x349   :  { %v886_v26 = vsub.f32 %v2328_v9, %v765_v61  ;;  %v2333_v61 = vld [vmem:[#allocation30_spill] sm:$0xff]  ;;  %v819_v55 = vpop.xlane.xlu2 %818 }
 0x34b   :  { %v2080_v57 = vpop.eup %1467  ;;  %v956_v46 = vmul.f32 1.442695, %v886_v26  ;;  %v930_v26 = vsub.f32 %v2335_v56, %v853_v1 }
 0x34c   :  { %2329 = vst [vmem:[#allocation49_spill] sm:$0xff] %v2080_v57  ;;  %1103 = vmatpush.xpose.msrb.mxu1 %v2080_v57  ;;  %v2084_v59 = vpop.eup %1469 }
 0x34d   :  { %1473 = vpow2.f32 %v956_v46  ;;  %2331 = vst [vmem:[#allocation38_spill] sm:$0xff] %v2084_v59  ;;  %v2089_v9 = vpop.eup %1471  ;;  %v1046_v46 = vmul.f32 1.442695, %v931_v39  ;;  %v1044_v44 = vmul.f32 1.442695, %v930_v26  ;;  %v757_v1 = vpop.xlane.xlu0 %756  ;;  %v2338_v39 = vld [vmem:[#allocation22_spill] sm:$0xff] }
 0x34e   :  { %1475 = vpow2.f32 %v954_v17  ;;  %2334 = vst [vmem:[#allocation36_spill] sm:$0xff] %v2089_v9 }
 0x34f   :  { %1477 = vpow2.f32 %v952_v20 }
 0x350   :  { %1104 = vmatpush.xpose.msrb.mxu1 %v2084_v59  ;;  %v857_v24 = vpop.xlane.xlu1 %856 }
 0x351   :  { %v932_v48 = vsub.f32 %v2333_v61, %v857_v24  ;;  %v2336_v24 = vld [vmem:[#allocation23_spill] sm:$0xff]  ;;  %v2337_v61 = vld [vmem:[#allocation26_spill] sm:$0xff] }
 0x352   :  { %v914_v62 = vsub.f32 %v2336_v24, %v821_v11  ;;  %v789_v11 = vpop.xlane.xlu2 %788 }
 0x353   :  { %v2091_v30 = vpop.eup %1473  ;;  %v1048_v4 = vmul.f32 1.442695, %v932_v48 }
 0x354   :  { %1081 = vmatpush.xpose.msrb.mxu0 %v2091_v30  ;;  %1105 = vmatpush.xpose.msrb.mxu1 %v2089_v9  ;;  %v2096_v21 = vpop.eup %1475  ;;  %v1012_v26 = vmul.f32 1.442695, %v914_v62 }
 0x355   :  { %1479 = vpow2.f32 %v1048_v4  ;;  %v2101_v48 = vpop.eup %1477  ;;  %v913_v4 = vsub.f32 %v2338_v39, %v819_v55  ;;  %v849_v57 = vpop.xlane.xlu0 %848 }
 0x356   :  { %1481 = vpow2.f32 %v1046_v46 }
 0x357   :  { %1483 = vpow2.f32 %v1044_v44  ;;  %v1010_v24 = vmul.f32 1.442695, %v913_v4 }
 0x358   :  { %v823_v17 = vpop.xlane.xlu1 %822  ;;  %1082 = vmatpush.xpose.msrb.mxu0 %v2096_v21 }
 0x359   :  { %v915_v20 = vsub.f32 %v2337_v61, %v823_v17  ;;  %v2340_v61 = vld [vmem:[#allocation41_spill] sm:$0xff] }
 0x35a   :  { %v899_v59 = vsub.f32 %v2340_v61, %v791_v50 }
 0x35b   :  { %v2103_v56 = vpop.eup %1479  ;;  %v1014_v9 = vmul.f32 1.442695, %v915_v20  ;;  %v2341_v20 = vld [vmem:[#allocation42_spill] sm:$0xff] }
 0x35c   :  { %1083 = vmatpush.xpose.msrb.mxu0 %v2101_v48  ;;  %1152 = vmatpush.xpose.msrb.mxu3 %v2103_v56  ;;  %v2108_v46 = vpop.eup %1481  ;;  %v982_v4 = vmul.f32 1.442695, %v899_v59  ;;  %v2346_v59 = vld [vmem:[#allocation19_spill] sm:$0xff] }
 0x35d   :  { %1485 = vpow2.f32 %v1014_v9  ;;  %2339 = vst [vmem:[#allocation37_spill] sm:$0xff] %v2108_v46  ;;  %v2113_v28 = vpop.eup %1483  ;;  %v2342_v9 = vld [vmem:[#allocation40_spill] sm:$0xff] }
 0x35e   :  { %1487 = vpow2.f32 %v1012_v26  ;;  %v898_v62 = vsub.f32 %v2342_v9, %v789_v11 }
 0x35f   :  { %1489 = vpow2.f32 %v1010_v24 }
 0x360   :  { %v793_v17 = vpop.xlane.xlu1 %792  ;;  %1153 = vmatpush.xpose.msrb.mxu3 %v2108_v46  ;;  %v980_v50 = vmul.f32 1.442695, %v898_v62 }
 0x361   :  { %v900_v44 = vsub.f32 %v2341_v20, %v793_v17  ;;  %v2344_v17 = vld [vmem:[#allocation21_spill] sm:$0xff] }
 0x362   :  { %v882_v20 = vsub.f32 %v2344_v17, %v757_v1  ;;  %v2347_v1 = vld [vmem:[#allocation20_spill] sm:$0xff] }
 0x363   :  { %v2115_v55 = vpop.eup %1485  ;;  %v984_v39 = vmul.f32 1.442695, %v900_v44  ;;  %v755_v44 = vpop.xlane.xlu2 %754  ;;  %v928_v17 = vsub.f32 %v2347_v1, %v849_v57 }
 0x364   :  { %1130 = vmatpush.xpose.msrb.mxu2 %v2115_v55  ;;  %1154 = vmatpush.xpose.msrb.mxu3 %v2113_v28  ;;  %v2120_v26 = vpop.eup %1487  ;;  %v948_v62 = vmul.f32 1.442695, %v882_v20 }
 0x365   :  { %1491 = vpow2.f32 %v984_v39  ;;  %2343 = vst [vmem:[#allocation34_spill] sm:$0xff] %v2120_v26  ;;  %v2125_v46 = vpop.eup %1489  ;;  %v881_v39 = vsub.f32 %v2346_v59, %v755_v44 }
 0x366   :  { %1493 = vpow2.f32 %v982_v4  ;;  %v753_v4 = vpop.xlane.xlu0 %752 }
 0x367   :  { %1495 = vpow2.f32 %v980_v50 }
 0x368   :  { %v759_v61 = vpop.xlane.xlu1 %758  ;;  %1131 = vmatpush.xpose.msrb.mxu2 %v2120_v26 }
 0x369   :  { %v883_v24 = vsub.f32 %v1671_v14, %v759_v61  ;;  %v946_v14 = vmul.f32 1.442695, %v881_v39 }
 0x36b   :  { %v2127_v11 = vpop.eup %1491  ;;  %v950_v9 = vmul.f32 1.442695, %v883_v24  ;;  %v2348_v24 = vld [vmem:[#allocation18_spill] sm:$0xff] }
 0x36c   :  { %2345 = vst [vmem:[#allocation32_spill] sm:$0xff] %v2127_v11  ;;  %1106 = vmatpush.xpose.msrb.mxu1 %v2127_v11  ;;  %1132 = vmatpush.xpose.msrb.mxu2 %v2125_v46  ;;  %v2132_v26 = vpop.eup %1493  ;;  %v880_v50 = vsub.f32 %v2348_v24, %v753_v4 }
 0x36d   :  { %1497 = vpow2.f32 %v950_v9  ;;  %v2138_v59 = vpop.eup %1495  ;;  %v1040_v9 = vmul.f32 1.442695, %v928_v17 }
 0x36e   :  { %1499 = vpow2.f32 %v948_v62  ;;  %v944_v57 = vmul.f32 1.442695, %v880_v50 }
 0x36f   :  { %1501 = vpow2.f32 %v946_v14 }
 0x370   :  { %v851_v61 = vpop.xlane.xlu1 %850  ;;  %1107 = vmatpush.xpose.msrb.mxu1 %v2132_v26 }
 0x371   :  { %v929_v44 = vsub.f32 %v1669_v13, %v851_v61  ;;  %v785_v61 = vpop.xlane.xlu2 %784 }
 0x373   :  { %v2140_v11 = vpop.eup %1497  ;;  %v1042_v20 = vmul.f32 1.442695, %v929_v44 }
 0x374   :  { %1084 = vmatpush.xpose.msrb.mxu0 %v2140_v11  ;;  %1108 = vmatpush.xpose.msrb.mxu1 %v2138_v59  ;;  %v2144_v39 = vpop.eup %1499 }
 0x375   :  { %1503 = vpow2.f32 %v1042_v20  ;;  %v2148_v4 = vpop.eup %1501 }
 0x376   :  { %1505 = vpow2.f32 %v1040_v9  ;;  %v2350_v9 = vld [vmem:[#allocation48_spill] sm:$0xff] }
 0x377   :  { %1507 = vpow2.f32 %v944_v57 }
 0x378   :  { %v817_v62 = vpop.xlane.xlu1 %816  ;;  %1085 = vmatpush.xpose.msrb.mxu0 %v2144_v39 }
 0x379   :  { %v912_v13 = vsub.f32 %v1660_v8, %v817_v62  ;;  %v2349_v8 = vld [vmem:[#allocation39_spill] sm:$0xff] }
 0x37a   :  { %v896_v44 = vsub.f32 %v2349_v8, %v785_v61 }
 0x37b   :  { %v2150_v1 = vpop.eup %1503  ;;  %v1008_v17 = vmul.f32 1.442695, %v912_v13 }
 0x37c   :  { %1086 = vmatpush.xpose.msrb.mxu0 %v2148_v4  ;;  %1155 = vmatpush.xpose.msrb.mxu3 %v2150_v1  ;;  %v2154_v14 = vpop.eup %1505  ;;  %v976_v13 = vmul.f32 1.442695, %v896_v44 }
 0x37d   :  { %1509 = vpow2.f32 %v1008_v17  ;;  %v2156_v24 = vpop.eup %1507 }
 0x380   :  { %v787_v50 = vpop.xlane.xlu1 %786  ;;  %1087 = vmatpush.xpose.msrb.mxu0 %v2156_v24  ;;  %1156 = vmatpush.xpose.msrb.mxu3 %v2154_v14 }
 0x381   :  { %v897_v20 = vsub.f32 %v1769_v3, %v787_v50 }
 0x383   :  { %v2164_v57 = vpop.eup %1509  ;;  %v978_v62 = vmul.f32 1.442695, %v897_v20 }
 0x384   :  { %1164 = vmatpush.xpose.msra.mxu0 %v1920_v51  ;;  %1224 = vmatpush.xpose.msra.mxu3 %v2350_v9  ;;  %v163_v51 = vld [vmem:[#allocation7] sm:$0xff] }
 0x385   :  { %1133 = vmatpush.xpose.msrb.mxu2 %v2164_v57  ;;  %1511 = vpow2.f32 %v978_v62  ;;  %1088 = vmatmul.f32.vlgmr.msrb.gmra.mxu0 %v163_v51 }
 0x386   :  { %1513 = vpow2.f32 %v976_v13 }
 0x388   :  { %1165 = vmatpush.xpose.msra.mxu0 %v1929_v47  ;;  %1225 = vmatpush.xpose.msra.mxu3 %v1900_v18  ;;  %v169_v47 = vld [vmem:[#allocation7 + $0x30] sm:$0xff] }
 0x389   :  { %1204 = vmatpush.xpose.msra.mxu2 %v1977_v38  ;;  %1157 = vmatmul.f32.vlgmr.msrb.gmra.mxu3 %v169_v47  ;;  %v2356_v38 = vld [vmem:[#allocation34_spill] sm:$0xff] }
 0x38b   :  { %v2173_v3 = vpop.eup %1511 }
 0x38c   :  { %1166 = vmatpush.xpose.msra.mxu0 %v1942_v33  ;;  %1226 = vmatpush.xpose.msra.mxu3 %v1909_v12  ;;  %v2179_v18 = vpop.eup %1513  ;;  %v167_v12 = vld [vmem:[#allocation7 + $0x20] sm:$0xff]  ;;  %v170_v33 = vld [vmem:[#allocation7 + $0x38] sm:$0xff] }
 0x38d   :  { %1205 = vmatpush.xpose.msra.mxu2 %v1989_v10  ;;  %1109 = vmatpush.xpose.msrb.mxu1 %v2173_v3 }
 0x38e   :  { %1134 = vmatmul.f32.vlgmr.msrb.gmra.mxu2 %v167_v12 }
 0x390   :  { %1167 = vmatpush.xpose.msra.mxu0 %v1957_v5  ;;  %1227 = vmatpush.xpose.msra.mxu3 %v1917_v60  ;;  %v164_v60 = vld [vmem:[#allocation7 + $0x8] sm:$0xff]  ;;  %v2351_v5 = vld [vmem:[#allocation49_spill] sm:$0xff] }
 0x391   :  { %1206 = vmatpush.xpose.msra.mxu2 %v2001_v49  ;;  %1110 = vmatpush.xpose.msrb.mxu1 %v2179_v18 }
 0x392   :  { %1091 = vmatmul.f32.gmra.mxu0 %v164_v60  ;;  %1160 = vmatmul.f32.gmra.mxu3 %v170_v33 }
 0x394   :  { %1168 = vmatpush.xpose.msra.mxu0 %v1969_v42  ;;  %1228 = vmatpush.xpose.msra.mxu3 %v1931_v37  ;;  %v168_v37 = vld [vmem:[#allocation7 + $0x28] sm:$0xff]  ;;  %v2354_v42 = vld [vmem:[#allocation38_spill] sm:$0xff] }
 0x395   :  { %1184 = vmatpush.xpose.msra.mxu1 %v1945_v35  ;;  %1207 = vmatpush.xpose.msra.mxu2 %v2012_v63  ;;  %v165_v35 = vld [vmem:[#allocation7 + $0x10] sm:$0xff] }
 0x396   :  { %1137 = vmatmul.f32.gmra.mxu2 %v168_v37  ;;  %1111 = vmatmul.f32.vlgmr.msrb.gmra.mxu1 %v165_v35 }
 0x398   :  { %1169 = vmatpush.xpose.msra.mxu0 %v1983_v6  ;;  %1229 = vmatpush.xpose.msra.mxu3 %v1947_v45  ;;  %v166_v45 = vld [vmem:[#allocation7 + $0x18] sm:$0xff]  ;;  %v2357_v6 = vld [vmem:[#allocation32_spill] sm:$0xff] }
 0x399   :  { %1185 = vmatpush.xpose.msra.mxu1 %v1961_v40  ;;  %1208 = vmatpush.xpose.msra.mxu2 %v2024_v34  ;;  %v2352_v40 = vld [vmem:[#allocation47_spill] sm:$0xff] }
 0x39c   :  { %1170 = vmatpush.xpose.msra.mxu0 %v1995_v31  ;;  %1230 = vmatpush.xpose.msra.mxu3 %v1963_v58  ;;  %v2353_v58 = vld [vmem:[#allocation37_spill] sm:$0xff] }
 0x39d   :  { %1186 = vmatpush.xpose.msra.mxu1 %v1973_v54  ;;  %1209 = vmatpush.xpose.msra.mxu2 %v2031_v22  ;;  %v2355_v54 = vld [vmem:[#allocation36_spill] sm:$0xff] }
 0x39e   :  { %1114 = vmatmul.f32.gmra.mxu1 %v166_v45 }
 0x3a0   :  { %1171 = vmatpush.xpose.msra.mxu0 %v2006_v43  ;;  %1231 = vmatpush.xpose.msra.mxu3 %v2022_v2 }
 0x3a1   :  { %1187 = vmatpush.xpose.msra.mxu1 %v1987_v16  ;;  %1210 = vmatpush.xpose.msra.mxu2 %v2039_v32  ;;  %v1577_v16 = vmov 1.0  }
 0x3a4   :  { %1172 = vmatpush.xpose.msra.mxu0 %v2018_v19  ;;  %1232 = vmatpush.xpose.msra.mxu3 %v2049_v25 }
 0x3a5   :  { %1188 = vmatpush.xpose.msra.mxu1 %v1999_v29  ;;  %1211 = vmatpush.xpose.msra.mxu2 %v2044_v53 }
 0x3a8   :  { %1173 = vmatpush.xpose.msra.mxu0 %v2091_v30  ;;  %1233 = vmatpush.xpose.msra.mxu3 %v2071_v41 }
 0x3a9   :  { %1189 = vmatpush.xpose.msra.mxu1 %v2010_v7  ;;  %1212 = vmatpush.xpose.msra.mxu2 %v2051_v23 }
 0x3ac   :  { %1174 = vmatpush.xpose.msra.mxu0 %v2096_v21  ;;  %1234 = vmatpush.xpose.msra.mxu3 %v2075_v27 }
 0x3ad   :  { %1190 = vmatpush.xpose.msra.mxu1 %v2037_v15  ;;  %1213 = vmatpush.xpose.msra.mxu2 %v2055_v52 }
 0x3b0   :  { %1175 = vmatpush.xpose.msra.mxu0 %v2101_v48  ;;  %1235 = vmatpush.xpose.msra.mxu3 %v2103_v56 }
 0x3b1   :  { %1191 = vmatpush.xpose.msra.mxu1 %v2060_v36  ;;  %1214 = vmatpush.xpose.msra.mxu2 %v2062_v0 }
 0x3b4   :  { %1176 = vmatpush.xpose.msra.mxu0 %v2140_v11  ;;  %1236 = vmatpush.xpose.msra.mxu3 %v2353_v58 }
 0x3b5   :  { %1192 = vmatpush.xpose.msra.mxu1 %v2351_v5  ;;  %1215 = vmatpush.xpose.msra.mxu2 %v2352_v40 }
 0x3b8   :  { %1177 = vmatpush.xpose.msra.mxu0 %v2144_v39  ;;  %1237 = vmatpush.xpose.msra.mxu3 %v2113_v28 }
 0x3b9   :  { %1193 = vmatpush.xpose.msra.mxu1 %v2354_v42  ;;  %1216 = vmatpush.xpose.msra.mxu2 %v2115_v55 }
 0x3bc   :  { %1178 = vmatpush.xpose.msra.mxu0 %v2148_v4  ;;  %1238 = vmatpush.xpose.msra.mxu3 %v2150_v1 }
 0x3bd   :  { %1194 = vmatpush.xpose.msra.mxu1 %v2355_v54  ;;  %1217 = vmatpush.xpose.msra.mxu2 %v2356_v38 }
 0x3c0   :  { %1179 = vmatpush.xpose.msra.mxu0 %v2156_v24  ;;  %1239 = vmatpush.xpose.msra.mxu3 %v2154_v14 }
 0x3c1   :  { %1195 = vmatpush.xpose.msra.mxu1 %v2357_v6  ;;  %1218 = vmatpush.xpose.msra.mxu2 %v2125_v46 }
 0x3c3   :  { %1180 = vmatmul.f32.vlgmr.msra.gmra.mxu0 %v1577_v16  ;;  %1240 = vmatmul.f32.vlgmr.msra.gmra.mxu3 %v1577_v16 }
 0x3c5   :  { %1196 = vmatpush.xpose.msra.mxu1 %v2132_v26  ;;  %1219 = vmatpush.xpose.msra.mxu2 %v2164_v57 }
 0x3c8   :  { %1220 = vmatmul.f32.vlgmr.msra.gmra.mxu2 %v1577_v16 }
 0x3c9   :  { %1197 = vmatpush.xpose.msra.mxu1 %v2138_v59 }
 0x3cd   :  { %1198 = vmatpush.xpose.msra.mxu1 %v2173_v3 }
 0x3d1   :  { %1199 = vmatpush.xpose.msra.mxu1 %v2179_v18 }
 0x3d4   :  { %1200 = vmatmul.f32.vlgmr.msra.gmra.mxu1 %v1577_v16 }
 0x402   :  { %v1089_v10 = vpop.f32.mrf.mxu0 }
 0x40c   :  { %v1158_v31 = vpop.f32.mrf.mxu3 }
 0x40f   :  { %v1092_v29 = vpop.f32.mrf.mxu0 }
 0x411   :  { %v1135_v49 = vpop.f32.mrf.mxu2 }
 0x413   :  { %v1112_v43 = vpop.f32.mrf.mxu1 }
 0x415   :  { %v1161_v7 = vpop.f32.mrf.mxu3 }
 0x419   :  { %v1138_v19 = vpop.f32.mrf.mxu2 }
 0x41b   :  { %v1115_v2 = vpop.f32.mrf.mxu1 }
 0x440   :  { %v1181_v63 = vpop.f32.mrf.mxu0 }
 0x441   :  { %1515 = vrcp.f32 %v1181_v63 }
 0x446   :  { %v1241_v22 = vpop.f32.mrf.mxu3 }
 0x447   :  { %v1516_v34 = vpop.eup %1515  ;;  %1517 = vrcp.f32 %v1241_v22 }
 0x448   :  { %v1248_v15 = vperm.slane %v1516_v34, 0 }
 0x44a   :  { %v1252_v32 = vmul.f32 %v1248_v15, %v1089_v10  ;;  %v1253_v53 = vmul.f32 %v1248_v15, %v1092_v29 }
 0x44b   :  { %v1221_v25 = vpop.f32.mrf.mxu2 }
 0x44c   :  { %1260 = vst [vmem:[#allocation8] sm:$0xff] %v1252_v32  ;;  %1519 = vrcp.f32 %v1221_v25 }
 0x44d   :  { %1261 = vst [vmem:[#allocation8 + $0x8] sm:$0xff] %v1253_v53  ;;  %v1518_v23 = vpop.eup %1517 }
 0x44e   :  { %v1251_v52 = vperm.slane %v1518_v23, 0 }
 0x450   :  { %v1258_v0 = vmul.f32 %v1251_v52, %v1158_v31  ;;  %v1259_v28 = vmul.f32 %v1251_v52, %v1161_v7 }
 0x451   :  { %v1201_v36 = vpop.f32.mrf.mxu1 }
 0x452   :  { %1521 = vrcp.f32 %v1201_v36  ;;  %v1520_v41 = vpop.eup %1519  ;;  %1266 = vst [vmem:[#allocation8 + $0x30] sm:$0xff] %v1258_v0 }
 0x453   :  { %v1250_v27 = vperm.slane %v1520_v41, 0  ;;  %1267 = vst [vmem:[#allocation8 + $0x38] sm:$0xff] %v1259_v28 }
 0x455   :  { %v1256_v30 = vmul.f32 %v1250_v27, %v1135_v49  ;;  %v1257_v21 = vmul.f32 %v1250_v27, %v1138_v19 }
 0x457   :  { %1264 = vst [vmem:[#allocation8 + $0x20] sm:$0xff] %v1256_v30 }
 0x458   :  { %v1522_v48 = vpop.eup %1521  ;;  %1265 = vst [vmem:[#allocation8 + $0x28] sm:$0xff] %v1257_v21 }
 0x459   :  { %v1249_v56 = vperm.slane %v1522_v48, 0 }
 0x45b   :  { %v1254_v46 = vmul.f32 %v1249_v56, %v1112_v43  ;;  %v1255_v55 = vmul.f32 %v1249_v56, %v1115_v2 }
 0x45d   :  { %1262 = vst [vmem:[#allocation8 + $0x10] sm:$0xff] %v1254_v46 }
 0x45e   :  { %1263 = vst [vmem:[#allocation8 + $0x18] sm:$0xff] %v1255_v55 }
 0x45f   :  { %1280 = dma.vmem_to_hbm [thread:$0]  %s1273_s29, 1024, %s1275_s5, [#allocation4], %s1579_s6, %s1579_s6, %s1580_s7  }
 0x460   :  { %1551 = dma.done.wait [#allocation4], 1024  }
 0x461   :  { %1552 = vsyncadd [#allocation4], 4294966272 }
 0x462   :  { %1285 = vsyncpa [#allocation3], 1 }
 0x463   :  { %1286 = vsyncpa [#allocation6], 1 }
 0x464   :  { %1287 = vsyncpa [#allocation4], 1 }

</bundles_post_ra>
